<compile_context>
chip_gen: v7x
topology: tpu7x:2x2x1
jax: 0.10.0
libtpu: 0.0.40
codegen_flags: <defaults>
</compile_context>

<pallas_src>
import jax
import jax.numpy as jnp
import numpy as np
from jax import lax
from jax.experimental import pallas as pl
from jax.experimental.pallas import tpu as pltpu


def _labelwise_head_kernel(x_ref, w_ref, b_ref, o_ref):
    # x_ref: (1, L, H, TS) input tile (VMEM)
    # w_ref: (L, H, 1) float32, resident (VMEM)
    # b_ref: (L,)      float32 (SMEM)
    # o_ref: (1, L, TS) output tile (VMEM)
    n_labels = w_ref.shape[0]

    def per_label(l, carry):
        xl = x_ref[0, l].astype(jnp.float32)            # (H, TS) slab, f32 accumulate
        wl = w_ref[l]                                   # (H, 1) column, lane broadcast
        acc = jnp.sum(xl * wl, axis=0, keepdims=True)   # (1, TS) sublane reduce
        acc = acc + b_ref[l]                            # scalar bias from SMEM
        o_ref[0, pl.ds(l, 1), :] = acc.astype(o_ref.dtype)
        return carry

    # Per-label loop bounds the live vreg set to ~H*TS elements (instead of
    # L*H*TS); unroll=True keeps everything visible to the LLO scheduler.
    lax.fori_loop(0, n_labels, per_label, 0, unroll=True)


def _normalize_input(x, n_labels, hidden):
    """torch's x.squeeze() analogue, but protect the batch axis from collapsing."""
    x = jnp.squeeze(x)
    if x.ndim == 3:            # batch dim of size 1 got squeezed away
        x = x[None, ...]
    if x.ndim != 4 or x.shape[1] != n_labels or x.shape[2] != hidden:
        raise ValueError(
            f"expected x squeezable to (B, {n_labels}, {hidden}, S), got {x.shape}")
    return x


def _pick_seq_tile(s_pad, hidden, n_labels, x_itemsize, out_itemsize):
    """Largest lane tile (multiple of 128) that keeps the per-label (H, TS)
    slab in a handful of vregs and double-buffered tiles well inside VMEM
    (sized for v7x's 64 MiB; v6e/v5e simply have more headroom)."""
    for ts in (1024, 512, 256, 128):
        if s_pad % ts:
            continue
        slab_bytes = hidden * ts * 4                                  # f32 working set
        tile_bytes = 2 * n_labels * ts * (hidden * x_itemsize + out_itemsize)
        if slab_bytes <= 64 * 1024 and tile_bytes <= 24 * (1 << 20):
            return ts
    return 128


def labelwise_head(x, weight, bias):
    """x: (B, n_labels, hidden, S), possibly with extra size-1 dims (as in torch);
       weight: (n_labels, hidden); bias: (n_labels,)."""
    n_labels, hidden = weight.shape
    x = _normalize_input(x, n_labels, hidden)
    B, L, H, S = x.shape
    out_dtype = jnp.result_type(x.dtype, weight.dtype)

    # Lane-dense layout: pad S up to a multiple of 128 so every output store is
    # an unmasked, full-width vector store.
    s_pad = pl.cdiv(S, 128) * 128
    if s_pad != S:
        x = jnp.pad(x, ((0, 0), (0, 0), (0, 0), (0, s_pad - S)))

    x_itemsize = jnp.dtype(x.dtype).itemsize
    out_itemsize = jnp.dtype(out_dtype).itemsize
    ts = _pick_seq_tile(s_pad, H, L, x_itemsize, out_itemsize)

    # Parameters: weight as (L, H, 1) f32 column table (VMEM resident), bias as
    # (L,) f32 scalars in SMEM.
    w_col = weight.astype(jnp.float32).reshape(L, H, 1)
    b_vec = bias.astype(jnp.float32)

    # Explicit VMEM budget: double-buffered x/out tiles + resident lane-padded
    # weight, with headroom.  Portable down to v7x's 64 MiB VMEM.
    vmem_bytes = (2 * L * H * ts * x_itemsize
                  + 2 * L * ts * out_itemsize
                  + 2 * L * H * 128 * 4)
    vmem_limit = min(int(1.5 * vmem_bytes) + (8 << 20), 96 << 20)

    grid = (B, s_pad // ts)
    out_padded = pl.pallas_call(
        _labelwise_head_kernel,
        out_shape=jax.ShapeDtypeStruct((B, L, s_pad), out_dtype),
        grid_spec=pltpu.PrefetchScalarGridSpec(
            num_scalar_prefetch=0,
            grid=grid,
            in_specs=[
                # per-(batch, seq-tile) block of x
                pl.BlockSpec((1, L, H, ts), lambda b, s: (b, 0, 0, s)),
                # full weight table, resident across the grid
                pl.BlockSpec((L, H, 1), lambda b, s: (0, 0, 0)),
                # bias lives whole in SMEM (scalar path)
                pl.BlockSpec(memory_space=pltpu.MemorySpace.SMEM),
            ],
            out_specs=pl.BlockSpec((1, L, ts), lambda b, s: (b, 0, s)),
        ),
        compiler_params=pltpu.CompilerParams(
            dimension_semantics=("parallel", "parallel"),
            vmem_limit_bytes=vmem_limit,
        ),
    )(x, w_col, b_vec)

    return out_padded[:, :, :S] if s_pad != S else out_padded


def labelwise_head_ref(x, weight, bias):
    """Pure-JAX reference (mirrors the PyTorch forward)."""
    L, H = weight.shape
    x = _normalize_input(x, L, H)
    out = (x.astype(jnp.float32) * weight.astype(jnp.float32)[None, :, :, None]).sum(axis=2)
    out = out + bias.astype(jnp.float32)[None, :, None]
    return out.astype(jnp.result_type(x.dtype, weight.dtype))


if __name__ == "__main__":
    B, n_labels, hidden, S = 2, 8, 32, 16

    key = jax.random.PRNGKey(0)
    kx, kw, kb = jax.random.split(key, 3)

    # deterministic synthetic parameters (torch.randn analog)
    weight = jax.random.normal(kw, (n_labels, hidden), dtype=jnp.float32)
    bias = jax.random.normal(kb, (n_labels,), dtype=jnp.float32)

    # example input (B, n_labels, hidden, S)
    x = jax.random.normal(kx, (B, n_labels, hidden, S), dtype=jnp.float32)

    out = jax.block_until_ready(labelwise_head(x, weight, bias))
    ref = labelwise_head_ref(x, weight, bias)
    np.testing.assert_allclose(np.asarray(out), np.asarray(ref), rtol=1e-5, atol=1e-5)

    # also exercise the squeeze-protection path (B == 1, extra singleton dim)
    x1 = jax.random.normal(kx, (1, n_labels, hidden, S, 1), dtype=jnp.float32)
    out1 = jax.block_until_ready(labelwise_head(x1, weight, bias))
    ref1 = labelwise_head_ref(x1, weight, bias)
    np.testing.assert_allclose(np.asarray(out1), np.asarray(ref1), rtol=1e-5, atol=1e-5)

    print("KERNEL_OK")
</pallas_src>

<mosaic_0001>
module attributes {stable_mosaic.version = 11 : i64} {
  func.func @_labelwise_head_kernel(%arg0: i32, %arg1: i32, %arg2: memref<1x8x32x128xf32, #tpu.memory_space<vmem>>, %arg3: memref<8x32x1xf32, #tpu.memory_space<vmem>>, %arg4: memref<8xf32, #tpu.memory_space<smem>>, %arg5: memref<1x8x128xf32, #tpu.memory_space<vmem>>) attributes {dimension_semantics = [#tpu.dimension_semantics<parallel>, #tpu.dimension_semantics<parallel>], iteration_bounds = array<i64: 2, 1>, scalar_prefetch = 0 : i64, scratch_operands = 0 : i64, tpu.core_type = #tpu.core_type<tc>, window_params = [{transform_indices = @transform_0, window_bounds = array<i64: 1, 8, 32, 128>}, {pipeline_mode = #tpu.pipeline_mode<synchronous>, transform_indices = @transform_1, window_bounds = array<i64: 8, 32, 1>}, {transform_indices = @transform_2, window_bounds = array<i64: 8>}, {transform_indices = @transform_3, window_bounds = array<i64: 1, 8, 128>}]} {
    %c0_i32 = arith.constant 0 : i32
    %c0 = arith.constant 0 : index
    %0 = arith.index_cast %c0_i32 : i32 to index
    %c0_0 = arith.constant 0 : index
    %c0_1 = arith.constant 0 : index
    %1 = vector.load %arg2[%c0, %0, %c0_0, %c0_1] : memref<1x8x32x128xf32, #tpu.memory_space<vmem>>, vector<1x1x32x128xf32>
    %2 = vector.shape_cast %1 : vector<1x1x32x128xf32> to vector<32x128xf32>
    %3 = arith.index_cast %c0_i32 : i32 to index
    %c0_2 = arith.constant 0 : index
    %c0_3 = arith.constant 0 : index
    %4 = vector.load %arg3[%3, %c0_2, %c0_3] : memref<8x32x1xf32, #tpu.memory_space<vmem>>, vector<1x32x1xf32>
    %5 = vector.shape_cast %4 : vector<1x32x1xf32> to vector<32x1xf32>
    %6 = vector.broadcast %5 : vector<32x1xf32> to vector<32x128xf32>
    %7 = arith.mulf %2, %6 : vector<32x128xf32>
    %cst = arith.constant dense<0.000000e+00> : vector<128xf32>
    %8 = vector.multi_reduction <add>, %7, %cst [0] : vector<32x128xf32> to vector<128xf32>
    %9 = vector.shape_cast %8 : vector<128xf32> to vector<1x128xf32>
    %10 = arith.index_cast %c0_i32 : i32 to index
    %11 = memref.load %arg4[%10] : memref<8xf32, #tpu.memory_space<smem>>
    %12 = vector.broadcast %11 : f32 to vector<1x128xf32>
    %13 = arith.addf %9, %12 : vector<1x128xf32>
    %c0_4 = arith.constant 0 : index
    %14 = arith.index_cast %c0_i32 : i32 to index
    %c0_5 = arith.constant 0 : index
    %15 = vector.load %arg5[%c0_4, %14, %c0_5] : memref<1x8x128xf32, #tpu.memory_space<vmem>>, vector<1x1x128xf32>
    %16 = vector.shape_cast %15 : vector<1x1x128xf32> to vector<1x128xf32>
    %17 = vector.shape_cast %13 : vector<1x128xf32> to vector<1x1x128xf32>
    tpu.vector_store %arg5[%c0_4, %14, %c0_5], %17 {strides = array<i32>} : memref<1x8x128xf32, #tpu.memory_space<vmem>>, vector<1x1x128xf32>,
    %c1_i32 = arith.constant 1 : i32
    %c0_6 = arith.constant 0 : index
    %18 = arith.index_cast %c1_i32 : i32 to index
    %c0_7 = arith.constant 0 : index
    %c0_8 = arith.constant 0 : index
    %19 = vector.load %arg2[%c0_6, %18, %c0_7, %c0_8] : memref<1x8x32x128xf32, #tpu.memory_space<vmem>>, vector<1x1x32x128xf32>
    %20 = vector.shape_cast %19 : vector<1x1x32x128xf32> to vector<32x128xf32>
    %21 = arith.index_cast %c1_i32 : i32 to index
    %c0_9 = arith.constant 0 : index
    %c0_10 = arith.constant 0 : index
    %22 = vector.load %arg3[%21, %c0_9, %c0_10] : memref<8x32x1xf32, #tpu.memory_space<vmem>>, vector<1x32x1xf32>
    %23 = vector.shape_cast %22 : vector<1x32x1xf32> to vector<32x1xf32>
    %24 = vector.broadcast %23 : vector<32x1xf32> to vector<32x128xf32>
    %25 = arith.mulf %20, %24 : vector<32x128xf32>
    %cst_11 = arith.constant dense<0.000000e+00> : vector<128xf32>
    %26 = vector.multi_reduction <add>, %25, %cst_11 [0] : vector<32x128xf32> to vector<128xf32>
    %27 = vector.shape_cast %26 : vector<128xf32> to vector<1x128xf32>
    %28 = arith.index_cast %c1_i32 : i32 to index
    %29 = memref.load %arg4[%28] : memref<8xf32, #tpu.memory_space<smem>>
    %30 = vector.broadcast %29 : f32 to vector<1x128xf32>
    %31 = arith.addf %27, %30 : vector<1x128xf32>
    %c0_12 = arith.constant 0 : index
    %32 = arith.index_cast %c1_i32 : i32 to index
    %c0_13 = arith.constant 0 : index
    %33 = vector.load %arg5[%c0_12, %32, %c0_13] : memref<1x8x128xf32, #tpu.memory_space<vmem>>, vector<1x1x128xf32>
    %34 = vector.shape_cast %33 : vector<1x1x128xf32> to vector<1x128xf32>
    %35 = vector.shape_cast %31 : vector<1x128xf32> to vector<1x1x128xf32>
    tpu.vector_store %arg5[%c0_12, %32, %c0_13], %35 {strides = array<i32>} : memref<1x8x128xf32, #tpu.memory_space<vmem>>, vector<1x1x128xf32>,
    %c2_i32 = arith.constant 2 : i32
    %c0_14 = arith.constant 0 : index
    %36 = arith.index_cast %c2_i32 : i32 to index
    %c0_15 = arith.constant 0 : index
    %c0_16 = arith.constant 0 : index
    %37 = vector.load %arg2[%c0_14, %36, %c0_15, %c0_16] : memref<1x8x32x128xf32, #tpu.memory_space<vmem>>, vector<1x1x32x128xf32>
    %38 = vector.shape_cast %37 : vector<1x1x32x128xf32> to vector<32x128xf32>
    %39 = arith.index_cast %c2_i32 : i32 to index
    %c0_17 = arith.constant 0 : index
    %c0_18 = arith.constant 0 : index
    %40 = vector.load %arg3[%39, %c0_17, %c0_18] : memref<8x32x1xf32, #tpu.memory_space<vmem>>, vector<1x32x1xf32>
    %41 = vector.shape_cast %40 : vector<1x32x1xf32> to vector<32x1xf32>
    %42 = vector.broadcast %41 : vector<32x1xf32> to vector<32x128xf32>
    %43 = arith.mulf %38, %42 : vector<32x128xf32>
    %cst_19 = arith.constant dense<0.000000e+00> : vector<128xf32>
    %44 = vector.multi_reduction <add>, %43, %cst_19 [0] : vector<32x128xf32> to vector<128xf32>
    %45 = vector.shape_cast %44 : vector<128xf32> to vector<1x128xf32>
    %46 = arith.index_cast %c2_i32 : i32 to index
    %47 = memref.load %arg4[%46] : memref<8xf32, #tpu.memory_space<smem>>
    %48 = vector.broadcast %47 : f32 to vector<1x128xf32>
    %49 = arith.addf %45, %48 : vector<1x128xf32>
    %c0_20 = arith.constant 0 : index
    %50 = arith.index_cast %c2_i32 : i32 to index
    %c0_21 = arith.constant 0 : index
    %51 = vector.load %arg5[%c0_20, %50, %c0_21] : memref<1x8x128xf32, #tpu.memory_space<vmem>>, vector<1x1x128xf32>
    %52 = vector.shape_cast %51 : vector<1x1x128xf32> to vector<1x128xf32>
    %53 = vector.shape_cast %49 : vector<1x128xf32> to vector<1x1x128xf32>
    tpu.vector_store %arg5[%c0_20, %50, %c0_21], %53 {strides = array<i32>} : memref<1x8x128xf32, #tpu.memory_space<vmem>>, vector<1x1x128xf32>,
    %c3_i32 = arith.constant 3 : i32
    %c0_22 = arith.constant 0 : index
    %54 = arith.index_cast %c3_i32 : i32 to index
    %c0_23 = arith.constant 0 : index
    %c0_24 = arith.constant 0 : index
    %55 = vector.load %arg2[%c0_22, %54, %c0_23, %c0_24] : memref<1x8x32x128xf32, #tpu.memory_space<vmem>>, vector<1x1x32x128xf32>
    %56 = vector.shape_cast %55 : vector<1x1x32x128xf32> to vector<32x128xf32>
    %57 = arith.index_cast %c3_i32 : i32 to index
    %c0_25 = arith.constant 0 : index
    %c0_26 = arith.constant 0 : index
    %58 = vector.load %arg3[%57, %c0_25, %c0_26] : memref<8x32x1xf32, #tpu.memory_space<vmem>>, vector<1x32x1xf32>
    %59 = vector.shape_cast %58 : vector<1x32x1xf32> to vector<32x1xf32>
    %60 = vector.broadcast %59 : vector<32x1xf32> to vector<32x128xf32>
    %61 = arith.mulf %56, %60 : vector<32x128xf32>
    %cst_27 = arith.constant dense<0.000000e+00> : vector<128xf32>
    %62 = vector.multi_reduction <add>, %61, %cst_27 [0] : vector<32x128xf32> to vector<128xf32>
    %63 = vector.shape_cast %62 : vector<128xf32> to vector<1x128xf32>
    %64 = arith.index_cast %c3_i32 : i32 to index
    %65 = memref.load %arg4[%64] : memref<8xf32, #tpu.memory_space<smem>>
    %66 = vector.broadcast %65 : f32 to vector<1x128xf32>
    %67 = arith.addf %63, %66 : vector<1x128xf32>
    %c0_28 = arith.constant 0 : index
    %68 = arith.index_cast %c3_i32 : i32 to index
    %c0_29 = arith.constant 0 : index
    %69 = vector.load %arg5[%c0_28, %68, %c0_29] : memref<1x8x128xf32, #tpu.memory_space<vmem>>, vector<1x1x128xf32>
    %70 = vector.shape_cast %69 : vector<1x1x128xf32> to vector<1x128xf32>
    %71 = vector.shape_cast %67 : vector<1x128xf32> to vector<1x1x128xf32>
    tpu.vector_store %arg5[%c0_28, %68, %c0_29], %71 {strides = array<i32>} : memref<1x8x128xf32, #tpu.memory_space<vmem>>, vector<1x1x128xf32>,
    %c4_i32 = arith.constant 4 : i32
    %c0_30 = arith.constant 0 : index
    %72 = arith.index_cast %c4_i32 : i32 to index
    %c0_31 = arith.constant 0 : index
    %c0_32 = arith.constant 0 : index
    %73 = vector.load %arg2[%c0_30, %72, %c0_31, %c0_32] : memref<1x8x32x128xf32, #tpu.memory_space<vmem>>, vector<1x1x32x128xf32>
    %74 = vector.shape_cast %73 : vector<1x1x32x128xf32> to vector<32x128xf32>
    %75 = arith.index_cast %c4_i32 : i32 to index
    %c0_33 = arith.constant 0 : index
    %c0_34 = arith.constant 0 : index
    %76 = vector.load %arg3[%75, %c0_33, %c0_34] : memref<8x32x1xf32, #tpu.memory_space<vmem>>, vector<1x32x1xf32>
    %77 = vector.shape_cast %76 : vector<1x32x1xf32> to vector<32x1xf32>
    %78 = vector.broadcast %77 : vector<32x1xf32> to vector<32x128xf32>
    %79 = arith.mulf %74, %78 : vector<32x128xf32>
    %cst_35 = arith.constant dense<0.000000e+00> : vector<128xf32>
    %80 = vector.multi_reduction <add>, %79, %cst_35 [0] : vector<32x128xf32> to vector<128xf32>
    %81 = vector.shape_cast %80 : vector<128xf32> to vector<1x128xf32>
    %82 = arith.index_cast %c4_i32 : i32 to index
    %83 = memref.load %arg4[%82] : memref<8xf32, #tpu.memory_space<smem>>
    %84 = vector.broadcast %83 : f32 to vector<1x128xf32>
    %85 = arith.addf %81, %84 : vector<1x128xf32>
    %c0_36 = arith.constant 0 : index
    %86 = arith.index_cast %c4_i32 : i32 to index
    %c0_37 = arith.constant 0 : index
    %87 = vector.load %arg5[%c0_36, %86, %c0_37] : memref<1x8x128xf32, #tpu.memory_space<vmem>>, vector<1x1x128xf32>
    %88 = vector.shape_cast %87 : vector<1x1x128xf32> to vector<1x128xf32>
    %89 = vector.shape_cast %85 : vector<1x128xf32> to vector<1x1x128xf32>
    tpu.vector_store %arg5[%c0_36, %86, %c0_37], %89 {strides = array<i32>} : memref<1x8x128xf32, #tpu.memory_space<vmem>>, vector<1x1x128xf32>,
    %c5_i32 = arith.constant 5 : i32
    %c0_38 = arith.constant 0 : index
    %90 = arith.index_cast %c5_i32 : i32 to index
    %c0_39 = arith.constant 0 : index
    %c0_40 = arith.constant 0 : index
    %91 = vector.load %arg2[%c0_38, %90, %c0_39, %c0_40] : memref<1x8x32x128xf32, #tpu.memory_space<vmem>>, vector<1x1x32x128xf32>
    %92 = vector.shape_cast %91 : vector<1x1x32x128xf32> to vector<32x128xf32>
    %93 = arith.index_cast %c5_i32 : i32 to index
    %c0_41 = arith.constant 0 : index
    %c0_42 = arith.constant 0 : index
    %94 = vector.load %arg3[%93, %c0_41, %c0_42] : memref<8x32x1xf32, #tpu.memory_space<vmem>>, vector<1x32x1xf32>
    %95 = vector.shape_cast %94 : vector<1x32x1xf32> to vector<32x1xf32>
    %96 = vector.broadcast %95 : vector<32x1xf32> to vector<32x128xf32>
    %97 = arith.mulf %92, %96 : vector<32x128xf32>
    %cst_43 = arith.constant dense<0.000000e+00> : vector<128xf32>
    %98 = vector.multi_reduction <add>, %97, %cst_43 [0] : vector<32x128xf32> to vector<128xf32>
    %99 = vector.shape_cast %98 : vector<128xf32> to vector<1x128xf32>
    %100 = arith.index_cast %c5_i32 : i32 to index
    %101 = memref.load %arg4[%100] : memref<8xf32, #tpu.memory_space<smem>>
    %102 = vector.broadcast %101 : f32 to vector<1x128xf32>
    %103 = arith.addf %99, %102 : vector<1x128xf32>
    %c0_44 = arith.constant 0 : index
    %104 = arith.index_cast %c5_i32 : i32 to index
    %c0_45 = arith.constant 0 : index
    %105 = vector.load %arg5[%c0_44, %104, %c0_45] : memref<1x8x128xf32, #tpu.memory_space<vmem>>, vector<1x1x128xf32>
    %106 = vector.shape_cast %105 : vector<1x1x128xf32> to vector<1x128xf32>
    %107 = vector.shape_cast %103 : vector<1x128xf32> to vector<1x1x128xf32>
    tpu.vector_store %arg5[%c0_44, %104, %c0_45], %107 {strides = array<i32>} : memref<1x8x128xf32, #tpu.memory_space<vmem>>, vector<1x1x128xf32>,
    %c6_i32 = arith.constant 6 : i32
    %c0_46 = arith.constant 0 : index
    %108 = arith.index_cast %c6_i32 : i32 to index
    %c0_47 = arith.constant 0 : index
    %c0_48 = arith.constant 0 : index
    %109 = vector.load %arg2[%c0_46, %108, %c0_47, %c0_48] : memref<1x8x32x128xf32, #tpu.memory_space<vmem>>, vector<1x1x32x128xf32>
    %110 = vector.shape_cast %109 : vector<1x1x32x128xf32> to vector<32x128xf32>
    %111 = arith.index_cast %c6_i32 : i32 to index
    %c0_49 = arith.constant 0 : index
    %c0_50 = arith.constant 0 : index
    %112 = vector.load %arg3[%111, %c0_49, %c0_50] : memref<8x32x1xf32, #tpu.memory_space<vmem>>, vector<1x32x1xf32>
    %113 = vector.shape_cast %112 : vector<1x32x1xf32> to vector<32x1xf32>
    %114 = vector.broadcast %113 : vector<32x1xf32> to vector<32x128xf32>
    %115 = arith.mulf %110, %114 : vector<32x128xf32>
    %cst_51 = arith.constant dense<0.000000e+00> : vector<128xf32>
    %116 = vector.multi_reduction <add>, %115, %cst_51 [0] : vector<32x128xf32> to vector<128xf32>
    %117 = vector.shape_cast %116 : vector<128xf32> to vector<1x128xf32>
    %118 = arith.index_cast %c6_i32 : i32 to index
    %119 = memref.load %arg4[%118] : memref<8xf32, #tpu.memory_space<smem>>
    %120 = vector.broadcast %119 : f32 to vector<1x128xf32>
    %121 = arith.addf %117, %120 : vector<1x128xf32>
    %c0_52 = arith.constant 0 : index
    %122 = arith.index_cast %c6_i32 : i32 to index
    %c0_53 = arith.constant 0 : index
    %123 = vector.load %arg5[%c0_52, %122, %c0_53] : memref<1x8x128xf32, #tpu.memory_space<vmem>>, vector<1x1x128xf32>
    %124 = vector.shape_cast %123 : vector<1x1x128xf32> to vector<1x128xf32>
    %125 = vector.shape_cast %121 : vector<1x128xf32> to vector<1x1x128xf32>
    tpu.vector_store %arg5[%c0_52, %122, %c0_53], %125 {strides = array<i32>} : memref<1x8x128xf32, #tpu.memory_space<vmem>>, vector<1x1x128xf32>,
    %c7_i32 = arith.constant 7 : i32
    %c0_54 = arith.constant 0 : index
    %126 = arith.index_cast %c7_i32 : i32 to index
    %c0_55 = arith.constant 0 : index
    %c0_56 = arith.constant 0 : index
    %127 = vector.load %arg2[%c0_54, %126, %c0_55, %c0_56] : memref<1x8x32x128xf32, #tpu.memory_space<vmem>>, vector<1x1x32x128xf32>
    %128 = vector.shape_cast %127 : vector<1x1x32x128xf32> to vector<32x128xf32>
    %129 = arith.index_cast %c7_i32 : i32 to index
    %c0_57 = arith.constant 0 : index
    %c0_58 = arith.constant 0 : index
    %130 = vector.load %arg3[%129, %c0_57, %c0_58] : memref<8x32x1xf32, #tpu.memory_space<vmem>>, vector<1x32x1xf32>
    %131 = vector.shape_cast %130 : vector<1x32x1xf32> to vector<32x1xf32>
    %132 = vector.broadcast %131 : vector<32x1xf32> to vector<32x128xf32>
    %133 = arith.mulf %128, %132 : vector<32x128xf32>
    %cst_59 = arith.constant dense<0.000000e+00> : vector<128xf32>
    %134 = vector.multi_reduction <add>, %133, %cst_59 [0] : vector<32x128xf32> to vector<128xf32>
    %135 = vector.shape_cast %134 : vector<128xf32> to vector<1x128xf32>
    %136 = arith.index_cast %c7_i32 : i32 to index
    %137 = memref.load %arg4[%136] : memref<8xf32, #tpu.memory_space<smem>>
    %138 = vector.broadcast %137 : f32 to vector<1x128xf32>
    %139 = arith.addf %135, %138 : vector<1x128xf32>
    %c0_60 = arith.constant 0 : index
    %140 = arith.index_cast %c7_i32 : i32 to index
    %c0_61 = arith.constant 0 : index
    %141 = vector.load %arg5[%c0_60, %140, %c0_61] : memref<1x8x128xf32, #tpu.memory_space<vmem>>, vector<1x1x128xf32>
    %142 = vector.shape_cast %141 : vector<1x1x128xf32> to vector<1x128xf32>
    %143 = vector.shape_cast %139 : vector<1x128xf32> to vector<1x1x128xf32>
    tpu.vector_store %arg5[%c0_60, %140, %c0_61], %143 {strides = array<i32>} : memref<1x8x128xf32, #tpu.memory_space<vmem>>, vector<1x1x128xf32>,
    %c8_i32 = arith.constant 8 : i32
    return
  }
  func.func @transform_0(%arg0: i32, %arg1: i32) -> (i32, i32, i32, i32) {
    %c0_i32 = arith.constant 0 : i32
    %c0_i32_0 = arith.constant 0 : i32
    %c0_i32_1 = arith.constant 0 : i32
    return %arg0, %c0_i32, %c0_i32_0, %arg1 : i32, i32, i32, i32
  }
  func.func @transform_1(%arg0: i32, %arg1: i32) -> (i32, i32, i32) {
    %c0_i32 = arith.constant 0 : i32
    %c0_i32_0 = arith.constant 0 : i32
    %c0_i32_1 = arith.constant 0 : i32
    %c0_i32_2 = arith.constant 0 : i32
    return %c0_i32, %c0_i32_0, %c0_i32_1 : i32, i32, i32
  }
  func.func @transform_2(%arg0: i32, %arg1: i32) -> i32 {
    %c0_i32 = arith.constant 0 : i32
    %c0_i32_0 = arith.constant 0 : i32
    return %c0_i32 : i32
  }
  func.func @transform_3(%arg0: i32, %arg1: i32) -> (i32, i32, i32) {
    %c0_i32 = arith.constant 0 : i32
    %c0_i32_0 = arith.constant 0 : i32
    return %arg0, %c0_i32, %arg1 : i32, i32, i32
  }
}

</mosaic_0001>

<bundles_post_ra>
// kernel: tpu_custom_call.1
= control target key start
LH: loop header
LB: loop body
LE: loop exit
PB: predicated region body
PF: predicated region fallthrough
CT: control target
= control target key end

     0   :  { %8 = vsyncpa [#allocation3], 0  ;;  %s1383_s0 = inlined_call_operand.hbm [shape: f32[2,8,32,128], index: 0, kind: input, shape index: {}]   ;;  %s1384_s1 = inlined_call_operand.vmem [shape: f32[8,32,1], index: 1, kind: input, shape index: {}]   ;;  %s1385_s2 = inlined_call_operand.vmem [shape: f32[8], index: 2, kind: input, shape index: {}]   ;;  %s1386_s3 = inlined_call_operand.hbm [shape: f32[2,8,128], index: 3, kind: output, shape index: {}]  }
   0x1   :  { %10 = vsyncpa [#allocation3 + $0x1], 0 }
   0x2   :  { %11 = vsyncpa [#allocation5], 0 }
   0x3   :  { %12 = vsyncpa [#allocation4], 0 }
   0x4   :  { %14 = vsyncpa [#allocation4 + $0x1], 0  ;;  %s1019_s12 = smov 0   ;;  %s1021_s13 = smov 0  }
   0x5   :  { %s1023_s14 = smov 0   ;;  %s1025_s15 = smov 0  }
   0x6   :  { %s1027_s16 = smov 0   ;;  %s1029_s17 = smov 0  }
   0x7 LB: > { %s702_s18 = sadd.s32 4294967295, %s991_s17   ;;  %s703_s19 = sadd.s32 4294967294, %s991_s17   ;;  %s991_s17 = sphi %s1029_s17, %s20_s17   ;;  %s987_s16 = sphi %s1027_s16, %s1409_s16   ;;  %s983_s15 = sphi %s1025_s15, %s1408_s15   ;;  %s979_s14 = sphi %s1023_s14, %s1407_s14   ;;  %s975_s13 = sphi %s1021_s13, %s1406_s13   ;;  %s971_s12 = sphi %s1019_s12, %s1405_s12  }
   0x8   : > { %s41_s20 = sadd.s32 1, %s979_s14  ;;  %p48_p0 = scmp.ne.s32.totalorder %s979_s14, %s975_s13 }
   0x9   : > { %p49_p1 = scmp.eq.s32.totalorder %s991_s17, 0  ;;  %p54_p2 = scmp.ne.s32.totalorder %s975_s13, %s971_s12 }
   0xa   : > { %p1057_p3 = scmp.eq.s32.totalorder %s702_s18, 0  ;;  %p122_p4 = scmp.eq.s32.totalorder %s702_s18, 1 }
   0xb   : > { %p1061_p5 = por %p49_p1, %p48_p0  ;;  %p128_p6 = scmp.eq.s32.totalorder %s703_s19, 1 }
   0xc   : > { %s1391_s21 = scalar_select %p1057_p3, 1, 0 }
   0xd   : > { %p1067_p7 = por %p1057_p3, %p54_p2  ;;  %p1071_p8 = por %p122_p4, %p48_p0 }
   0xe   : > { %p1075_p9 = por %p128_p6, %p54_p2  ;;  %p704_p10 = scmp.ge.s32.totalorder %s991_s17, 1 }
   0xf   : > { %s1393_s23 = scalar_select %p1067_p7, 1, 0 }
  0x10   : > { %s1394_s24 = scalar_select %p1071_p8, 1, 0 }
  0x11   : > { %s1395_s25 = scalar_select %p1075_p9, 1, 0 }
  0x12   : > { %p135_p11 = scmp.lt.s32.totalorder %s991_s17, 3  ;;  %s151_s28 = sshll.u32 %s1385_s2, 4  ;;  %s152_s28 = int_to_ptr.vmem [resolvable:$true] %s151_s28 }
  0x13   : > { %p803_p0 = scmp.lt.s32.totalorder %s991_s17, 2  ;;  %s32_s5 = sadd.s32 1, %s987_s16 }
  0x14   : > { %p1084_p12 = pnand %p704_p10, %p135_p11  ;;  %p1105_p6 = scmp.ge.s32.totalorder %s32_s5, 2 }
  0x15   : > { %p1094_p2 = pnand %p803_p0, %p1061_p5  ;;  %s162_s7 = sand.u32 1, %s979_s14  }
  0x16   : > { %p790_p1 = pneg %p1084_p12  ;;  %s860_s8 = scalar_lea.vmem %s152_s28, 16 }
  0x17   : > { %p861_p10 = scmp.ne.s32.totalorder %s152_s28, %s860_s8  ;;  %p868_p13 = scmp.lt.s32.totalorder %s152_s28, %s152_s28 }
  0x18   : > { %p1100_p4 = pnand %p790_p1, %p1057_p3  ;;  %p869_p9 = scmp.lt.s32.totalorder %s860_s8, %s860_s8 }
  0x1a   : > { %p862_p11 = pneg %p1100_p4  ;;  %p870_p8 = por %p869_p9, %p868_p13 }
  0x1c   : > { %p863_p5 = pnand %p862_p11, %p861_p10 }
  0x1e   : > { %p864_p0 = pneg %p863_p5 }
  0x20   : > { %p871_p1 = pnand %p870_p8, %p864_p0 }
  0x22   : > { %874 = shalt.err (!%p871_p1)
}
  0x23   : > { %s993_s9 = smov [#allocation6]   ;;  %s1411_s5 = smov (%p1105_p6, %s32_s5), 0 }
  0x24   : > { %793 = dma.vmem_to_smem (!%p1100_p4), %s152_s28, 16, %s993_s9, [#allocation5]  }
  0x25   : > { %s707_s10 = sshll.u32 %s162_s7, 8  ;;  %s36_s11 = ssub.s32 %s987_s16, %s1411_s5 }
  0x26   : > { %p39_p9 = scmp.eq.s32.totalorder %s36_s11, 0  ;;  %s781_s18 = sshll.u32 %s987_s16, 12 }
  0x27   : > { %s1124_s26 = scalar_lea.hbm %s1383_s0, %s781_s18  ;;  %s166_s27 = scalar_lea.vmem [#allocation2], %s707_s10 }
  0x28   : > { %s174_s4 = sshll.u32 %s166_s27, 4  ;;  %s1133_s6 = scalar_lea.sflag [#allocation3], %s162_s7  ;;  %s1131_s4 = int_to_ptr.vmem [resolvable:$true] %s174_s4 }
  0x29   : > { %s1129_s28 = scalar_select %p39_p9, %s979_s14, %s41_s20  }
  0x2a   : > { %s875_s8 = scalar_lea.hbm %s1124_s26, 4096  ;;  %p877_p13 = pneg %p1094_p2 }
  0x2b   : > { %p876_p8 = scmp.ne.s32.totalorder %s1124_s26, %s875_s8  ;;  %s880_s10 = scalar_lea.hbm %s1383_s0, 8192 }
  0x2c   : > { %p881_p10 = scmp.lt.u32.totalorder %s1124_s26, %s1383_s0  ;;  %p882_p11 = scmp.lt.u32.totalorder %s880_s10, %s875_s8 }
  0x2d   : > { %p878_p4 = pnand %p877_p13, %p876_p8  ;;  %p884_p0 = scmp.lt.u32.totalorder %s875_s8, %s1124_s26 }
  0x2e   : > { %p883_p5 = por %p882_p11, %p881_p10 }
  0x2f   : > { %p879_p6 = pneg %p878_p4 }
  0x30   : > { %p885_p1 = por %p884_p0, %p883_p5 }
  0x32   : > { %p886_p9 = pnand %p885_p1, %p879_p6 }
  0x34   : > { %889 = shalt.err (!%p886_p9)
}
  0x35   : > { %s890_s20 = scalar_lea.vmem %s1131_s4, 4096  ;;  %s994_s7 = smov [#allocation2]  }
  0x36   : > { %p891_p8 = scmp.ne.s32.totalorder %s1131_s4, %s890_s20  ;;  %s895_s22 = sshll.u32 %s994_s7, 4  ;;  %s896_s22 = int_to_ptr.vmem [resolvable:$false] %s895_s22 }
  0x37   : > { %s897_s27 = scalar_lea.vmem %s896_s22, 8192  ;;  %p898_p7 = scmp.lt.s32.totalorder %s1131_s4, %s896_s22 }
  0x38   : > { %p893_p4 = pnand %p891_p8, %p877_p13  ;;  %p899_p10 = scmp.lt.s32.totalorder %s897_s27, %s890_s20 }
  0x3a   : > { %p894_p3 = pneg %p893_p4  ;;  %p900_p11 = por %p899_p10, %p898_p7 }
  0x3c   : > { %p901_p5 = pnand %p900_p11, %p894_p3 }
  0x3e   : > { %904 = shalt.err (!%p901_p5)
}
  0x3f   : > { %s995_s8 = smov 128   ;;  %s996_s9 = smov 8  }
  0x40   : > { %797 = dma.hbm_to_vmem [thread:$0]  (!%p1094_p2), %s1124_s26, 4096, %s1131_s4, %s1133_s6, %s995_s8, %s995_s8, %s996_s9  }
  0x41   : > { %186 = sbr.rel (%p1084_p12) target bundleno = 301 (0x12d), region = 32  ;;  %s1164_s11 = sand.u32 (!%p1084_p12), 1, %s975_s13  }
  0x42   : > { %s711_s10 = sshll.u32 (!%p1084_p12), %s1164_s11, 8  ;;  %s189_s18 = scalar_lea.sflag (!%p1084_p12), [#allocation3], %s1164_s11 }
  0x43   : > { %s1168_s19 = scalar_lea.vmem (!%p1084_p12), [#allocation2], %s711_s10  ;;  %p1400_p3 = scmp.ne.s32.totalorder (!%p1084_p12), %s1393_s23, 0 }
  0x48   : > { %958 = dma.done.wait (%p1400_p3), %s189_s18, 4096  }
  0x49   : > { %960 = vsyncadd (%p1400_p3), %s189_s18, 4294963200  ;;  %p1401_p7 = scmp.ne.s32.totalorder %s1391_s21, 0 }
  0x4b   : > { %962 = dma.done.wait (%p1401_p7), [#allocation5], 16  }
  0x4c   : > { %964 = vsyncadd (%p1401_p7), [#allocation5], 4294967280 }
  0x4d   : > { %201 = sfence }
  0x4e   : > { %v226_v0 = vld [vmem:[%s1384_s1 + $0x10] sm:$0xff]  ;;  %v224_v1 = vld [vmem:[%s1384_s1] sm:$0xff]  ;;  %v997_v2 = vmov 0   ;;  %v227_v3 = vld [vmem:[%s1384_s1 + $0x18] sm:$0xff]  ;;  %s261_s23 = sld [smem:[#allocation6]]  ;;  %s722_s6 = sld [smem:[#allocation6 + $0x1]] }
  0x4f   : > { %859 = vset.pattern.permute.xlu1 %v997_v2  ;;  %858 = vset.pattern.permute.xlu0 %v997_v2  ;;  %v225_v4 = vld [vmem:[%s1384_s1 + $0x8] sm:$0xff]  ;;  %v718_v6 = vld [vmem:[%s1384_s1 + $0x20] sm:$0xff]  ;;  %v721_v7 = vld [vmem:[%s1384_s1 + $0x38] sm:$0xff]  ;;  %s713_s21 = sshll.u32 %s1164_s11, 3  ;;  %s1309_s7 = sld [smem:[#allocation6 + $0x3]] }
  0x50   : > { %240 = vperm.xlu1 %859, %v226_v0   ;;  %230 = vperm.xlu0 %858, %v224_v1   ;;  %v719_v5 = vld [vmem:[%s1384_s1 + $0x28] sm:$0xff]  ;;  %v720_v8 = vld [vmem:[%s1384_s1 + $0x30] sm:$0xff]  ;;  %v727_v10 = vld [vmem:[%s1384_s1 + $0x40] sm:$0xff]  ;;  %s1283_s20 = scalar_lea.vmem [#allocation7], %s713_s21  ;;  %s1311_s22 = sld [smem:[#allocation6 + $0x2]] }
  0x51   : > { %v728_v9 = vld [vmem:[%s1384_s1 + $0x48] sm:$0xff]  ;;  %v736_v12 = vld [vmem:[%s1384_s1 + $0x60] sm:$0xff]  ;;  %v738_v21 = vld [vmem:[%s1384_s1 + $0x70] sm:$0xff]  ;;  %s1315_s27 = sld [smem:[#allocation6 + $0x5]]  ;;  %s1317_s8 = sld [smem:[#allocation6 + $0x4]] }
  0x52   : > { %v737_v11 = vld [vmem:[%s1384_s1 + $0x68] sm:$0xff]  ;;  %v745_v14 = vld [vmem:[%s1384_s1 + $0x80] sm:$0xff]  ;;  %v729_v22 = vld [vmem:[%s1384_s1 + $0x50] sm:$0xff]  ;;  %s767_s9 = sld [smem:[#allocation6 + $0x6]]  ;;  %s778_s10 = sshll.u32 %s983_s15, 7 }
  0x53   : > { %v746_v13 = vld [vmem:[%s1384_s1 + $0x88] sm:$0xff]  ;;  %v754_v16 = vld [vmem:[%s1384_s1 + $0xa0] sm:$0xff]  ;;  %v756_v23 = vld [vmem:[%s1384_s1 + $0xb0] sm:$0xff]  ;;  %s609_s18 = sshll.u32 %s1283_s20, 4  ;;  %s1332_s26 = scalar_lea.hbm %s1386_s3, %s778_s10  ;;  %s1334_s18 = int_to_ptr.vmem [resolvable:$true] %s609_s18 }
  0x54   : > { %245 = vperm.xlu1 %859, %v227_v3   ;;  %235 = vperm.xlu0 %858, %v225_v4   ;;  %v755_v15 = vld [vmem:[%s1384_s1 + $0xa8] sm:$0xff]  ;;  %v763_v18 = vld [vmem:[%s1384_s1 + $0xc0] sm:$0xff]  ;;  %v747_v24 = vld [vmem:[%s1384_s1 + $0x90] sm:$0xff]  ;;  %s595_s4 = scalar_lea.sflag [#allocation4], %s1164_s11  ;;  %p1402_p2 = scmp.ne.s32.totalorder %s1394_s24, 0 }
  0x55   : > { %v764_v17 = vld [vmem:[%s1384_s1 + $0xc8] sm:$0xff]  ;;  %v772_v20 = vld [vmem:[%s1384_s1 + $0xe0] sm:$0xff]  ;;  %v774_v25 = vld [vmem:[%s1384_s1 + $0xf0] sm:$0xff]  ;;  %s998_s15 = smov [#allocation7]  }
  0x56   : > { %v773_v19 = vld [vmem:[%s1384_s1 + $0xe8] sm:$0xff]  ;;  %v765_v26 = vld [vmem:[%s1384_s1 + $0xd0] sm:$0xff]  ;;  %v739_v27 = vld [vmem:[%s1384_s1 + $0x78] sm:$0xff] }
  0x57   : > { %v730_v28 = vld [vmem:[%s1384_s1 + $0x58] sm:$0xff]  ;;  %v220_v35 = vld [vmem:[%s1168_s19] sm:$0xff]  ;;  %v221_v36 = vld [vmem:[%s1168_s19 + $0x8] sm:$0xff] }
  0x58   : > { %282 = vperm.xlu1 %859, %v719_v5   ;;  %277 = vperm.xlu0 %858, %v718_v6   ;;  %v757_v29 = vld [vmem:[%s1384_s1 + $0xb8] sm:$0xff]  ;;  %v222_v37 = vld [vmem:[%s1168_s19 + $0x10] sm:$0xff]  ;;  %v715_v43 = vld [vmem:[%s1168_s19 + $0x28] sm:$0xff] }
  0x59   : > { %v748_v30 = vld [vmem:[%s1384_s1 + $0x98] sm:$0xff]  ;;  %v714_v44 = vld [vmem:[%s1168_s19 + $0x20] sm:$0xff]  ;;  %v716_v53 = vld [vmem:[%s1168_s19 + $0x30] sm:$0xff] }
  0x5a   : > { %v775_v31 = vld [vmem:[%s1384_s1 + $0xf8] sm:$0xff] }
  0x5b   : > { %v766_v32 = vld [vmem:[%s1384_s1 + $0xd8] sm:$0xff] }
  0x5c   : > { %292 = vperm.xlu1 %859, %v721_v7   ;;  %287 = vperm.xlu0 %858, %v720_v8   ;;  %v223_v42 = vld [vmem:[%s1168_s19 + $0x18] sm:$0xff] }
  0x5d   : > { %v717_v55 = vld [vmem:[%s1168_s19 + $0x38] sm:$0xff] }
  0x60   : > { %329 = vperm.xlu1 %859, %v728_v9   ;;  %324 = vperm.xlu0 %858, %v727_v10   ;;  %v262_v10 = vstv %s261_s23  ;;  %s905_s23 = scalar_lea.vmem %s1334_s18, 128 }
  0x61   : > { %p906_p12 = scmp.ne.s32.totalorder %s1334_s18, %s905_s23 }
  0x63   : > { %p907_p13 = pnand %p906_p12, %p1402_p2 }
  0x64   : > { %376 = vperm.xlu1 %859, %v737_v11   ;;  %371 = vperm.xlu0 %858, %v736_v12  }
  0x65   : > { %p908_p6 = pneg %p907_p13 }
  0x68   : > { %423 = vperm.xlu1 %859, %v746_v13   ;;  %418 = vperm.xlu0 %858, %v745_v14  }
  0x6c   : > { %470 = vperm.xlu1 %859, %v755_v15   ;;  %465 = vperm.xlu0 %858, %v754_v16  }
  0x70   : > { %517 = vperm.xlu1 %859, %v764_v17   ;;  %512 = vperm.xlu0 %858, %v763_v18   ;;  %v309_v18 = vstv %s722_s6  ;;  %s909_s6 = sshll.u32 %s998_s15, 4  ;;  %s910_s6 = int_to_ptr.vmem [resolvable:$false] %s909_s6 }
  0x71   : > { %s911_s21 = scalar_lea.vmem %s910_s6, 256  ;;  %p912_p0 = scmp.lt.s32.totalorder %s1334_s18, %s910_s6 }
  0x72   : > { %p913_p1 = scmp.lt.s32.totalorder %s911_s21, %s905_s23 }
  0x74   : > { %564 = vperm.xlu1 %859, %v773_v19   ;;  %559 = vperm.xlu0 %858, %v772_v20   ;;  %p914_p9 = por %p913_p1, %p912_p0 }
  0x76   : > { %p915_p8 = pnand %p914_p9, %p908_p6 }
  0x78   : > { %381 = vperm.xlu1 %859, %v738_v21   ;;  %334 = vperm.xlu0 %858, %v729_v22  }
  0x7c   : > { %475 = vperm.xlu1 %859, %v756_v23   ;;  %428 = vperm.xlu0 %858, %v747_v24  }
  0x80   : > { %569 = vperm.xlu1 %859, %v774_v25   ;;  %522 = vperm.xlu0 %858, %v765_v26  }
  0x84   : > { %386 = vperm.xlu1 %859, %v739_v27   ;;  %339 = vperm.xlu0 %858, %v730_v28  }
  0x88   : > { %480 = vperm.xlu1 %859, %v757_v29   ;;  %433 = vperm.xlu0 %858, %v748_v30   ;;  %v724_v29 = vld [vmem:[%s1168_s19 + $0x48] sm:$0xff]  ;;  %v723_v30 = vld [vmem:[%s1168_s19 + $0x40] sm:$0xff] }
  0x8c   : > { %574 = vperm.xlu1 %859, %v775_v31   ;;  %527 = vperm.xlu0 %858, %v766_v32   ;;  %v733_v31 = vld [vmem:[%s1168_s19 + $0x68] sm:$0xff]  ;;  %v732_v32 = vld [vmem:[%s1168_s19 + $0x60] sm:$0xff] }
  0xcf   : > { %v241_v33 = vpop.permute.xlu1 %240  ;;  %v231_v34 = vpop.permute.xlu0 %230 }
  0xd0   : > { %v248_v40 = vmul.f32 %v231_v34, %v220_v35  ;;  %v250_v45 = vmul.f32 %v241_v33, %v222_v37  ;;  %v742_v35 = vld [vmem:[%s1168_s19 + $0x88] sm:$0xff]  ;;  %v725_v37 = vld [vmem:[%s1168_s19 + $0x50] sm:$0xff] }
  0xd3   : > { %v246_v38 = vpop.permute.xlu1 %245  ;;  %v236_v39 = vpop.permute.xlu0 %235 }
  0xd4   : > { %v249_v41 = vmul.f32 %v236_v39, %v221_v36  ;;  %v251_v49 = vmul.f32 %v246_v38, %v223_v42  ;;  %v734_v36 = vld [vmem:[%s1168_s19 + $0x70] sm:$0xff]  ;;  %v741_v42 = vld [vmem:[%s1168_s19 + $0x80] sm:$0xff] }
  0xd6   : > { %v252_v46 = vadd.f32 %v249_v41, %v248_v40 }
  0xd7   : > { %v283_v47 = vpop.permute.xlu1 %282  ;;  %v278_v48 = vpop.permute.xlu0 %277 }
  0xd8   : > { %v253_v50 = vadd.f32 %v252_v46, %v250_v45  ;;  %v296_v51 = vmul.f32 %v715_v43, %v283_v47  ;;  %v295_v52 = vmul.f32 %v714_v44, %v278_v48  ;;  %v751_v43 = vld [vmem:[%s1168_s19 + $0xa8] sm:$0xff]  ;;  %v750_v44 = vld [vmem:[%s1168_s19 + $0xa0] sm:$0xff] }
  0xda   : > { %v254_v54 = vadd.f32 %v253_v50, %v251_v49  ;;  %v299_v59 = vadd.f32 %v296_v51, %v295_v52  ;;  %v752_v49 = vld [vmem:[%s1168_s19 + $0xb0] sm:$0xff] }
  0xdb   : > { %v293_v56 = vpop.permute.xlu1 %292  ;;  %v288_v57 = vpop.permute.xlu0 %287  ;;  %v743_v50 = vld [vmem:[%s1168_s19 + $0x90] sm:$0xff] }
  0xdc   : > { %v255_v58 = vrot.slane %v254_v54, 4  ;;  %v297_v60 = vmul.f32 %v716_v53, %v288_v57  ;;  %v298_v62 = vmul.f32 %v717_v55, %v293_v56  ;;  %v735_v55 = vld [vmem:[%s1168_s19 + $0x78] sm:$0xff] }
  0xdd   : > { %v726_v56 = vld [vmem:[%s1168_s19 + $0x58] sm:$0xff] }
  0xde   : > { %v256_v61 = vadd.f32 %v255_v58, %v254_v54  ;;  %v300_v63 = vadd.f32 %v299_v59, %v297_v60  ;;  %v760_v59 = vld [vmem:[%s1168_s19 + $0xc8] sm:$0xff]  ;;  %v759_v60 = vld [vmem:[%s1168_s19 + $0xc0] sm:$0xff] }
  0xdf   : > { %v330_v0 = vpop.permute.xlu1 %329  ;;  %v325_v1 = vpop.permute.xlu0 %324 }
  0xe0   : > { %v257_v2 = vrot.slane %v256_v61, 2  ;;  %v301_v3 = vadd.f32 %v300_v63, %v298_v62  ;;  %v343_v38 = vmul.f32 %v724_v29, %v330_v0  ;;  %v342_v39 = vmul.f32 %v723_v30, %v325_v1  ;;  %v769_v1 = vld [vmem:[%s1168_s19 + $0xe8] sm:$0xff] }
  0xe2   : > { %v258_v4 = vadd.f32 %v257_v2, %v256_v61  ;;  %v302_v5 = vrot.slane %v301_v3, 4  ;;  %v346_v57 = vadd.f32 %v343_v38, %v342_v39  ;;  %v768_v2 = vld [vmem:[%s1168_s19 + $0xe0] sm:$0xff] }
  0xe3   : > { %v377_v6 = vpop.permute.xlu1 %376  ;;  %v372_v7 = vpop.permute.xlu0 %371 }
  0xe4   : > { %v259_v8 = vrot.slane %v258_v4, 1  ;;  %v303_v9 = vadd.f32 %v302_v5, %v301_v3  ;;  %v390_v40 = vmul.f32 %v733_v31, %v377_v6  ;;  %v389_v41 = vmul.f32 %v732_v32, %v372_v7 }
  0xe6   : > { %v260_v11 = vadd.f32 %v259_v8, %v258_v4  ;;  %v304_v12 = vrot.slane %v303_v9, 2  ;;  %v393_v58 = vadd.f32 %v390_v40, %v389_v41 }
  0xe7   : > { %v424_v13 = vpop.permute.xlu1 %423  ;;  %v419_v14 = vpop.permute.xlu0 %418 }
  0xe8   : > { %v263_v15 = vadd.f32 %v262_v10, %v260_v11  ;;  %v305_v16 = vadd.f32 %v304_v12, %v303_v9  ;;  %v437_v51 = vmul.f32 %v742_v35, %v424_v13  ;;  %v436_v52 = vmul.f32 %v741_v42, %v419_v14  ;;  %v753_v9 = vld [vmem:[%s1168_s19 + $0xb8] sm:$0xff]  ;;  %v770_v13 = vld [vmem:[%s1168_s19 + $0xf0] sm:$0xff] }
  0xe9   : > { %v744_v10 = vld [vmem:[%s1168_s19 + $0x98] sm:$0xff]  ;;  %v761_v14 = vld [vmem:[%s1168_s19 + $0xd0] sm:$0xff] }
  0xea   : > { %264 = vst [vmem:[%s1283_s20] sm:$0x1] %v263_v15  ;;  %v306_v17 = vrot.slane %v305_v16, 1  ;;  %v440_v7 = vadd.f32 %v437_v51, %v436_v52 }
  0xeb   : > { %v471_v19 = vpop.permute.xlu1 %470  ;;  %v466_v20 = vpop.permute.xlu0 %465 }
  0xec   : > { %v307_v21 = vadd.f32 %v306_v17, %v305_v16  ;;  %v484_v53 = vmul.f32 %v751_v43, %v471_v19  ;;  %v483_v54 = vmul.f32 %v750_v44, %v466_v20 }
  0xee   : > { %v310_v22 = vadd.f32 %v309_v18, %v307_v21  ;;  %v487_v8 = vadd.f32 %v484_v53, %v483_v54 }
  0xef   : > { %v518_v23 = vpop.permute.xlu1 %517  ;;  %v513_v24 = vpop.permute.xlu0 %512 }
  0xf0   : > { %311 = vst [vmem:[%s1283_s20 + $0x1] sm:$0x1] %v310_v22  ;;  %v531_v11 = vmul.f32 %v760_v59, %v518_v23  ;;  %v530_v12 = vmul.f32 %v759_v60, %v513_v24 }
  0xf2   : > { %v534_v35 = vadd.f32 %v531_v11, %v530_v12 }
  0xf3   : > { %v565_v25 = vpop.permute.xlu1 %564  ;;  %v560_v26 = vpop.permute.xlu0 %559 }
  0xf4   : > { %v578_v17 = vmul.f32 %v769_v1, %v565_v25  ;;  %v577_v18 = vmul.f32 %v768_v2, %v560_v26 }
  0xf7   : > { %v382_v27 = vpop.permute.xlu1 %381  ;;  %v335_v28 = vpop.permute.xlu0 %334 }
  0xf8   : > { %v391_v47 = vmul.f32 %v734_v36, %v382_v27  ;;  %v344_v48 = vmul.f32 %v725_v37, %v335_v28  ;;  %v581_v36 = vadd.f32 %v578_v17, %v577_v18 }
  0xfa   : > { %v394_v3 = vadd.f32 %v393_v58, %v391_v47  ;;  %v347_v4 = vadd.f32 %v346_v57, %v344_v48  ;;  %v403_v57 = vstv %s1309_s7  ;;  %v356_v58 = vstv %s1311_s22 }
  0xfb   : > { %v476_v33 = vpop.permute.xlu1 %475  ;;  %v429_v34 = vpop.permute.xlu0 %428 }
  0xfc   : > { %v485_v61 = vmul.f32 %v752_v49, %v476_v33  ;;  %v438_v62 = vmul.f32 %v743_v50, %v429_v34  ;;  %v771_v33 = vld [vmem:[%s1168_s19 + $0xf8] sm:$0xff] }
  0xfd   : > { %v762_v34 = vld [vmem:[%s1168_s19 + $0xd8] sm:$0xff]  ;;  %s776_s19 = sld [smem:[#allocation6 + $0x7]] }
  0xfe   : > { %v488_v19 = vadd.f32 %v487_v8, %v485_v61  ;;  %v441_v20 = vadd.f32 %v440_v7, %v438_v62  ;;  %v497_v7 = vstv %s1315_s27  ;;  %v450_v8 = vstv %s1317_s8 }
  0xff   : > { %v570_v45 = vpop.permute.xlu1 %569  ;;  %v523_v46 = vpop.permute.xlu0 %522 }
 0x100   : > { %v579_v31 = vmul.f32 %v770_v13, %v570_v45  ;;  %v532_v32 = vmul.f32 %v761_v14, %v523_v46 }
 0x102   : > { %v582_v43 = vadd.f32 %v581_v36, %v579_v31  ;;  %v535_v44 = vadd.f32 %v534_v35, %v532_v32 }
 0x103   : > { %v387_v63 = vpop.permute.xlu1 %386  ;;  %v340_v0 = vpop.permute.xlu0 %339 }
 0x104   : > { %v392_v5 = vmul.f32 %v735_v55, %v387_v63  ;;  %v345_v6 = vmul.f32 %v726_v56, %v340_v0 }
 0x106   : > { %v395_v15 = vadd.f32 %v394_v3, %v392_v5  ;;  %v348_v16 = vadd.f32 %v347_v4, %v345_v6 }
 0x107   : > { %v481_v21 = vpop.permute.xlu1 %480  ;;  %v434_v22 = vpop.permute.xlu0 %433 }
 0x108   : > { %v396_v27 = vrot.slane %v395_v15, 4  ;;  %v349_v28 = vrot.slane %v348_v16, 4  ;;  %v486_v29 = vmul.f32 %v753_v9, %v481_v21  ;;  %v439_v30 = vmul.f32 %v744_v10, %v434_v22 }
 0x10a   : > { %v397_v23 = vadd.f32 %v396_v27, %v395_v15  ;;  %v350_v24 = vadd.f32 %v349_v28, %v348_v16  ;;  %v489_v25 = vadd.f32 %v488_v19, %v486_v29  ;;  %v442_v26 = vadd.f32 %v441_v20, %v439_v30 }
 0x10b   : > { %v575_v37 = vpop.permute.xlu1 %574  ;;  %v528_v38 = vpop.permute.xlu0 %527  ;;  %v591_v19 = vstv %s776_s19  ;;  %v544_v20 = vstv %s767_s9 }
 0x10c   : > { %v398_v39 = vrot.slane %v397_v23, 2  ;;  %v351_v40 = vrot.slane %v350_v24, 2  ;;  %v490_v41 = vrot.slane %v489_v25, 4  ;;  %v443_v42 = vrot.slane %v442_v26, 4 }
 0x10d   : > { %v580_v45 = vmul.f32 %v771_v33, %v575_v37  ;;  %v533_v46 = vmul.f32 %v762_v34, %v528_v38 }
 0x10e   : > { %v399_v47 = vadd.f32 %v398_v39, %v397_v23  ;;  %v352_v48 = vadd.f32 %v351_v40, %v350_v24  ;;  %v491_v49 = vadd.f32 %v490_v41, %v489_v25  ;;  %v444_v50 = vadd.f32 %v443_v42, %v442_v26 }
 0x10f   : > { %v583_v51 = vadd.f32 %v582_v43, %v580_v45  ;;  %v536_v52 = vadd.f32 %v535_v44, %v533_v46 }
 0x110   : > { %v400_v53 = vrot.slane %v399_v47, 1  ;;  %v353_v54 = vrot.slane %v352_v48, 1  ;;  %v492_v55 = vrot.slane %v491_v49, 2  ;;  %v445_v56 = vrot.slane %v444_v50, 2 }
 0x111   : > { %v584_v59 = vrot.slane %v583_v51, 4  ;;  %v537_v60 = vrot.slane %v536_v52, 4 }
 0x112   : > { %v401_v61 = vadd.f32 %v400_v53, %v399_v47  ;;  %v354_v62 = vadd.f32 %v353_v54, %v352_v48  ;;  %v493_v63 = vadd.f32 %v492_v55, %v491_v49  ;;  %v446_v0 = vadd.f32 %v445_v56, %v444_v50 }
 0x113   : > { %v585_v1 = vadd.f32 %v584_v59, %v583_v51  ;;  %v538_v2 = vadd.f32 %v537_v60, %v536_v52 }
 0x114   : > { %v404_v3 = vadd.f32 %v403_v57, %v401_v61  ;;  %v357_v4 = vadd.f32 %v356_v58, %v354_v62  ;;  %v494_v5 = vrot.slane %v493_v63, 1  ;;  %v447_v6 = vrot.slane %v446_v0, 1 }
 0x115   : > { %v586_v9 = vrot.slane %v585_v1, 2  ;;  %v539_v10 = vrot.slane %v538_v2, 2 }
 0x116   : > { %405 = vst [vmem:[%s1283_s20 + $0x3] sm:$0x1] %v404_v3  ;;  %358 = vst [vmem:[%s1283_s20 + $0x2] sm:$0x1] %v357_v4  ;;  %v495_v11 = vadd.f32 %v494_v5, %v493_v63  ;;  %v448_v12 = vadd.f32 %v447_v6, %v446_v0 }
 0x117   : > { %v587_v13 = vadd.f32 %v586_v9, %v585_v1  ;;  %v540_v14 = vadd.f32 %v539_v10, %v538_v2 }
 0x118   : > { %v498_v15 = vadd.f32 %v497_v7, %v495_v11  ;;  %v451_v16 = vadd.f32 %v450_v8, %v448_v12 }
 0x119   : > { %v588_v17 = vrot.slane %v587_v13, 1  ;;  %v541_v18 = vrot.slane %v540_v14, 1 }
 0x11a   : > { %499 = vst [vmem:[%s1283_s20 + $0x5] sm:$0x1] %v498_v15  ;;  %452 = vst [vmem:[%s1283_s20 + $0x4] sm:$0x1] %v451_v16 }
 0x11b   : > { %v589_v21 = vadd.f32 %v588_v17, %v587_v13  ;;  %v542_v22 = vadd.f32 %v541_v18, %v540_v14 }
 0x11d   : > { %v592_v27 = vadd.f32 %v591_v19, %v589_v21  ;;  %v545_v28 = vadd.f32 %v544_v20, %v542_v22 }
 0x11f   : > { %593 = vst [vmem:[%s1283_s20 + $0x7] sm:$0x1] %v592_v27  ;;  %546 = vst [vmem:[%s1283_s20 + $0x6] sm:$0x1] %v545_v28 }
 0x120   : > { %918 = shalt.err (!%p915_p8)
}
 0x121   : > { %s919_s11 = scalar_lea.hbm %s1332_s26, 128  ;;  %s923_s22 = scalar_lea.hbm %s1386_s3, 256 }
 0x122   : > { %p920_p4 = scmp.ne.s32.totalorder %s1332_s26, %s919_s11  ;;  %p924_p5 = scmp.lt.u32.totalorder %s1332_s26, %s1386_s3 }
 0x123   : > { %p925_p3 = scmp.lt.u32.totalorder %s923_s22, %s919_s11  ;;  %p927_p12 = scmp.lt.u32.totalorder %s919_s11, %s1332_s26 }
 0x124   : > { %p921_p10 = pnand %p920_p4, %p1402_p2 }
 0x125   : > { %p926_p7 = por %p925_p3, %p924_p5 }
 0x126   : > { %p922_p11 = pneg %p921_p10 }
 0x127   : > { %p928_p13 = por %p927_p12, %p926_p7 }
 0x129   : > { %p929_p6 = pnand %p928_p13, %p922_p11 }
 0x12b   : > { %932 = shalt.err (!%p929_p6)
}
 0x12c   : > { %788 = dma.vmem_to_hbm [thread:$0]  (%p1402_p2), %s1334_s18, 128, %s1332_s26, %s595_s4  }
 0x12d PF: > { %s621_s19 = sand.u32 1, %s971_s12   ;;  %p1403_p0 = scmp.ne.s32.totalorder %s1395_s25, 0 }
 0x12e   : > { %p1404_p1 = scmp.ge.s32.totalorder %s991_s17, 2  ;;  %s622_s9 = scalar_lea.sflag [#allocation4], %s621_s19 }
 0x130   : > { %p799_p9 = pnand %p1404_p1, %p1403_p0 }
 0x132   : > { %966 = dma.done.wait (!%p799_p9), %s622_s9, 128  }
 0x133   : > { %968 = vsyncadd (!%p799_p9), %s622_s9, 4294967168  ;;  %s20_s17 = sadd.s32 1, %s991_s17   ;;  %s1405_s12 = smov %s975_s13 }
 0x134   : > { %p17_p8 = scmp.ge.s32.totalorder %s20_s17, 4   ;;  %s1406_s13 = smov %s979_s14 }
 0x135   : > { %s1407_s14 = smov %s1129_s28  ;;  %s1408_s15 = smov %s987_s16 }
 0x136   : > { %s1409_s16 = smov %s1411_s5  ;;  %19 = sbr.rel (!%p17_p8) target bundleno = 7 (0x7), region = 96 }
 0x13d   :  { %627 = vsyncpa [#allocation3], 1 }
 0x13e   :  { %629 = vsyncpa [#allocation3 + $0x1], 1 }
 0x13f   :  { %630 = vsyncpa [#allocation4], 1 }
 0x140   :  { %632 = vsyncpa [#allocation4 + $0x1], 1 }
 0x141   :  { %633 = vsyncpa [#allocation5], 1 }
 0x142   :  { %635 = vsyncpa [#allocation5 + $0x1], 1 }

</bundles_post_ra>
